<compile_context>
chip_gen: v6e
topology: v6e:2x2x1
jax: 0.10.0
libtpu: 0.0.40
codegen_flags: <defaults>
</compile_context>

<pallas_src>
import functools

import jax
import jax.numpy as jnp
import numpy as np
from jax import lax
from jax.experimental import pallas as pl
from jax.experimental.pallas import tpu as pltpu


# ----------------------------------------------------------------------------
# Fused kernel: blockwise combine (VPU) + patch-embed matmul (MXU) +
#               mean-over-patches (XLU reduce) + linear head (MXU)
# ----------------------------------------------------------------------------
def _make_fused_kernel(T, inv_p):
    """Build the fused kernel for T task vectors; inv_p = 1/num_patches."""

    def kernel(coef_ref, xp_ref, *refs):
        # refs layout: wc_base, wc_d[0..T), bc, wh_base, wh_d[0..T), bh, out
        i = 0
        wc_base = refs[i]; i += 1
        wc_ds = refs[i:i + T]; i += T
        bc_ref = refs[i]; i += 1
        wh_base = refs[i]; i += 1
        wh_ds = refs[i:i + T]; i += T
        bh_ref = refs[i]; i += 1
        out_ref = refs[i]

        # Blockwise task-vector combination (inputs are f32 already, no casts).
        #   Wc = Wc_base + sum_t coef[t, 0] * dWc_t      (D, K)
        #   Wh = Wh_base + sum_t coef[t, 2] * dWh_t      (E, D)
        # Weight refs are VMEM-resident across the batch grid (constant index
        # maps), so the per-step recombination is cheap VPU work and stays
        # correct under megacore "parallel" scheduling.
        wc = wc_base[...]
        wh = wh_base[...]
        for t in range(T):  # static, small T
            wc = wc + coef_ref[t, 0] * wc_ds[t][...]
            wh = wh + coef_ref[t, 2] * wh_ds[t][...]

        # Patch embedding: contract on K with Wc in native (D, K) layout.
        h = lax.dot_general(
            xp_ref[...], wc,
            dimension_numbers=(((1,), (1,)), ((), ())),
            preferred_element_type=jnp.float32)               # (P, D)
        h = h + bc_ref[...]                                   # + (1, D)

        # Mean over patches: sublane reduction instead of a pool matmul.
        pooled = jnp.sum(h, axis=0, keepdims=True) * inv_p    # (1, D)

        # Linear head, Wh in native (E, D) layout.
        out = lax.dot_general(
            pooled, wh,
            dimension_numbers=(((1,), (1,)), ((), ())),
            preferred_element_type=jnp.float32)               # (1, E)
        out = out + bh_ref[...]                               # + (1, E)
        out_ref[...] = out.astype(out_ref.dtype)

    return kernel


# ----------------------------------------------------------------------------
# WeightedImageEncoder forward (im2col glue in JAX, everything else fused)
# ----------------------------------------------------------------------------
def weighted_image_encoder_forward(x, coef, params, dparams, patch):
    """x: (B, C, H, W) NCHW.  coef: (T, num_blocks=4).  params: list of 4
    tensors [conv_w (D,C,p,p), conv_b (D,), head_w (E,D), head_b (E,)].
    dparams: list over T of lists with the same shapes (task vectors)."""
    conv_w, conv_b, head_w, head_b = params
    D, C, p, _ = conv_w.shape
    E = head_w.shape[0]
    B, _, H, W = x.shape
    gh, gw = H // p, W // p
    P = gh * gw
    K = C * p * p
    T = coef.shape[0]

    # im2col of the NCHW input: (B, P, K), rows=(gh,gw) patches, lanes=(c,ph,pw).
    xp = (x.reshape(B, C, gh, p, gw, p)
           .transpose(0, 2, 4, 1, 3, 5)
           .reshape(B, P, K)).astype(jnp.float32)

    # Weight slabs in native layout — no transposes between kernels.
    wc_base = conv_w.reshape(D, K).astype(jnp.float32)
    wh_base = head_w.astype(jnp.float32)                       # (E, D)
    wc_ds = [dparams[t][0].reshape(D, K).astype(jnp.float32) for t in range(T)]
    wh_ds = [dparams[t][2].astype(jnp.float32) for t in range(T)]

    # Bias blocks are tiny (<< one (8,128) tile): combine in plain JAX and
    # fold into the fused kernel instead of standalone padded pallas_calls.
    bc = conv_b + sum(coef[t, 1] * dparams[t][1] for t in range(T))   # (D,)
    bh = head_b + sum(coef[t, 3] * dparams[t][3] for t in range(T))   # (E,)
    bc = bc.reshape(1, D).astype(jnp.float32)
    bh = bh.reshape(1, E).astype(jnp.float32)

    kernel = _make_fused_kernel(T, float(1.0 / P))

    in_specs = (
        [pl.BlockSpec(memory_space=pltpu.MemorySpace.SMEM)]            # coef (T, 4) scalars
        + [pl.BlockSpec((None, P, K), lambda b: (b, 0, 0))]            # xp tile for batch b
        + [pl.BlockSpec((D, K), lambda b: (0, 0))] * (1 + T)           # Wc base + T deltas
        + [pl.BlockSpec((1, D), lambda b: (0, 0))]                     # combined conv bias
        + [pl.BlockSpec((E, D), lambda b: (0, 0))] * (1 + T)           # Wh base + T deltas
        + [pl.BlockSpec((1, E), lambda b: (0, 0))]                     # combined head bias
    )

    flops = 2 * B * P * K * D + 2 * B * D * E + 2 * B * T * (D * K + E * D)
    bytes_accessed = 4 * (B * P * K + (1 + T) * (D * K + E * D) + D + E + B * E)
    cost = pl.CostEstimate(flops=flops, transcendentals=0,
                           bytes_accessed=bytes_accessed)

    out3 = pl.pallas_call(
        kernel,
        out_shape=jax.ShapeDtypeStruct((B, 1, E), jnp.float32),
        grid=(B,),
        in_specs=in_specs,
        out_specs=pl.BlockSpec((None, 1, E), lambda b: (b, 0, 0)),
        compiler_params=pltpu.CompilerParams(
            dimension_semantics=("parallel",),
            vmem_limit_bytes=32 * 1024 * 1024),
        cost_estimate=cost,
    )(coef, xp, wc_base, *wc_ds, bc, wh_base, *wh_ds, bh)

    return out3.reshape(B, E)


# ----------------------------------------------------------------------------
# Pure-JAX reference (mirrors the PyTorch module semantics)
# ----------------------------------------------------------------------------
def reference_forward(x, coef, params, dparams, patch):
    T = coef.shape[0]
    new_params = []
    for k, pbase in enumerate(params):
        delta = sum(coef[t, k] * dparams[t][k] for t in range(T))
        new_params.append(pbase + delta)
    conv_w, conv_b, head_w, head_b = new_params
    h = lax.conv_general_dilated(
        x, conv_w, window_strides=(patch, patch), padding="VALID",
        dimension_numbers=("NCHW", "OIHW", "NCHW"))
    h = h + conv_b[None, :, None, None]
    feat = h.mean(axis=(2, 3))
    return feat @ head_w.T + head_b[None, :]


# ----------------------------------------------------------------------------
if __name__ == "__main__":
    # Small shapes: batch=2, channels=4, spatial=16, patch=8, hidden=32, T=3
    B, C, H, W = 2, 4, 16, 16
    patch = 8
    D = 32            # patch-embedding width
    E = 32            # output feature width
    T = 3             # number of task vectors
    K = C * patch * patch

    key = jax.random.PRNGKey(0)
    keys = jax.random.split(key, 6 + 4 * T)

    x = jax.random.normal(keys[0], (B, C, H, W), dtype=jnp.float32)

    # base encoder params (deterministic synthetic init)
    conv_w = 0.05 * jax.random.normal(keys[1], (D, C, patch, patch), jnp.float32)
    conv_b = 0.01 * jax.random.normal(keys[2], (D,), jnp.float32)
    head_w = 0.05 * jax.random.normal(keys[3], (E, D), jnp.float32)
    head_b = 0.01 * jax.random.normal(keys[4], (E,), jnp.float32)
    params = [conv_w, conv_b, head_w, head_b]

    # task vectors (deltas) with the same block shapes
    dparams = []
    for t in range(T):
        kt = keys[5 + 4 * t: 5 + 4 * (t + 1)]
        dparams.append([
            0.02 * jax.random.normal(kt[0], (D, C, patch, patch), jnp.float32),
            0.02 * jax.random.normal(kt[1], (D,), jnp.float32),
            0.02 * jax.random.normal(kt[2], (E, D), jnp.float32),
            0.02 * jax.random.normal(kt[3], (E,), jnp.float32),
        ])

    # blockwise coefficients (module inits them to zeros; use nonzero values
    # here so the combination path is actually exercised)
    coef = 0.1 * jax.random.normal(keys[5 + 4 * T], (T, len(params)), jnp.float32)

    fwd = jax.jit(functools.partial(weighted_image_encoder_forward, patch=patch))
    out = fwd(x, coef, params, dparams)
    out = jax.block_until_ready(out)

    ref = reference_forward(x, coef, params, dparams, patch)
    np.testing.assert_allclose(np.asarray(out), np.asarray(ref), atol=1e-4, rtol=1e-4)

    print("KERNEL_OK")
</pallas_src>

<mosaic_0001>
module attributes {stable_mosaic.version = 11 : i64} {
  func.func @kernel(%arg0: i32, %arg1: memref<3x4xf32, #tpu.memory_space<smem>>, %arg2: memref<1x4x256xf32, #tpu.memory_space<vmem>>, %arg3: memref<32x256xf32, #tpu.memory_space<vmem>>, %arg4: memref<32x256xf32, #tpu.memory_space<vmem>>, %arg5: memref<32x256xf32, #tpu.memory_space<vmem>>, %arg6: memref<32x256xf32, #tpu.memory_space<vmem>>, %arg7: memref<1x32xf32, #tpu.memory_space<vmem>>, %arg8: memref<32x32xf32, #tpu.memory_space<vmem>>, %arg9: memref<32x32xf32, #tpu.memory_space<vmem>>, %arg10: memref<32x32xf32, #tpu.memory_space<vmem>>, %arg11: memref<32x32xf32, #tpu.memory_space<vmem>>, %arg12: memref<1x32xf32, #tpu.memory_space<vmem>>, %arg13: memref<1x1x32xf32, #tpu.memory_space<vmem>>) attributes {dimension_semantics = [#tpu.dimension_semantics<parallel>], iteration_bounds = array<i64: 2>, scalar_prefetch = 0 : i64, scratch_operands = 0 : i64, tpu.core_type = #tpu.core_type<tc>, window_params = [{transform_indices = @transform_0, window_bounds = array<i64: 3, 4>}, {transform_indices = @transform_1, window_bounds = array<i64: 1, 4, 256>}, {pipeline_mode = #tpu.pipeline_mode<synchronous>, transform_indices = @transform_2, window_bounds = array<i64: 32, 256>}, {pipeline_mode = #tpu.pipeline_mode<synchronous>, transform_indices = @transform_3, window_bounds = array<i64: 32, 256>}, {pipeline_mode = #tpu.pipeline_mode<synchronous>, transform_indices = @transform_4, window_bounds = array<i64: 32, 256>}, {pipeline_mode = #tpu.pipeline_mode<synchronous>, transform_indices = @transform_5, window_bounds = array<i64: 32, 256>}, {pipeline_mode = #tpu.pipeline_mode<synchronous>, transform_indices = @transform_6, window_bounds = array<i64: 1, 32>}, {pipeline_mode = #tpu.pipeline_mode<synchronous>, transform_indices = @transform_7, window_bounds = array<i64: 32, 32>}, {pipeline_mode = #tpu.pipeline_mode<synchronous>, transform_indices = @transform_8, window_bounds = array<i64: 32, 32>}, {pipeline_mode = #tpu.pipeline_mode<synchronous>, transform_indices = @transform_9, window_bounds = array<i64: 32, 32>}, {pipeline_mode = #tpu.pipeline_mode<synchronous>, transform_indices = @transform_10, window_bounds = array<i64: 32, 32>}, {pipeline_mode = #tpu.pipeline_mode<synchronous>, transform_indices = @transform_11, window_bounds = array<i64: 1, 32>}, {transform_indices = @transform_12, window_bounds = array<i64: 1, 1, 32>}]} {
    %c0 = arith.constant 0 : index
    %c0_0 = arith.constant 0 : index
    %0 = vector.load %arg3[%c0, %c0_0] : memref<32x256xf32, #tpu.memory_space<vmem>>, vector<32x256xf32>
    %c0_1 = arith.constant 0 : index
    %c0_2 = arith.constant 0 : index
    %1 = vector.load %arg8[%c0_1, %c0_2] : memref<32x32xf32, #tpu.memory_space<vmem>>, vector<32x32xf32>
    %c0_3 = arith.constant 0 : index
    %c0_4 = arith.constant 0 : index
    %2 = memref.load %arg1[%c0_3, %c0_4] : memref<3x4xf32, #tpu.memory_space<smem>>
    %c0_5 = arith.constant 0 : index
    %c0_6 = arith.constant 0 : index
    %3 = vector.load %arg4[%c0_5, %c0_6] : memref<32x256xf32, #tpu.memory_space<vmem>>, vector<32x256xf32>
    %4 = vector.broadcast %2 : f32 to vector<32x256xf32>
    %5 = arith.mulf %4, %3 : vector<32x256xf32>
    %6 = arith.addf %0, %5 : vector<32x256xf32>
    %c0_7 = arith.constant 0 : index
    %c2 = arith.constant 2 : index
    %7 = memref.load %arg1[%c0_7, %c2] : memref<3x4xf32, #tpu.memory_space<smem>>
    %c0_8 = arith.constant 0 : index
    %c0_9 = arith.constant 0 : index
    %8 = vector.load %arg9[%c0_8, %c0_9] : memref<32x32xf32, #tpu.memory_space<vmem>>, vector<32x32xf32>
    %9 = vector.broadcast %7 : f32 to vector<32x32xf32>
    %10 = arith.mulf %9, %8 : vector<32x32xf32>
    %11 = arith.addf %1, %10 : vector<32x32xf32>
    %c1 = arith.constant 1 : index
    %c0_10 = arith.constant 0 : index
    %12 = memref.load %arg1[%c1, %c0_10] : memref<3x4xf32, #tpu.memory_space<smem>>
    %c0_11 = arith.constant 0 : index
    %c0_12 = arith.constant 0 : index
    %13 = vector.load %arg5[%c0_11, %c0_12] : memref<32x256xf32, #tpu.memory_space<vmem>>, vector<32x256xf32>
    %14 = vector.broadcast %12 : f32 to vector<32x256xf32>
    %15 = arith.mulf %14, %13 : vector<32x256xf32>
    %16 = arith.addf %6, %15 : vector<32x256xf32>
    %c1_13 = arith.constant 1 : index
    %c2_14 = arith.constant 2 : index
    %17 = memref.load %arg1[%c1_13, %c2_14] : memref<3x4xf32, #tpu.memory_space<smem>>
    %c0_15 = arith.constant 0 : index
    %c0_16 = arith.constant 0 : index
    %18 = vector.load %arg10[%c0_15, %c0_16] : memref<32x32xf32, #tpu.memory_space<vmem>>, vector<32x32xf32>
    %19 = vector.broadcast %17 : f32 to vector<32x32xf32>
    %20 = arith.mulf %19, %18 : vector<32x32xf32>
    %21 = arith.addf %11, %20 : vector<32x32xf32>
    %c2_17 = arith.constant 2 : index
    %c0_18 = arith.constant 0 : index
    %22 = memref.load %arg1[%c2_17, %c0_18] : memref<3x4xf32, #tpu.memory_space<smem>>
    %c0_19 = arith.constant 0 : index
    %c0_20 = arith.constant 0 : index
    %23 = vector.load %arg6[%c0_19, %c0_20] : memref<32x256xf32, #tpu.memory_space<vmem>>, vector<32x256xf32>
    %24 = vector.broadcast %22 : f32 to vector<32x256xf32>
    %25 = arith.mulf %24, %23 : vector<32x256xf32>
    %26 = arith.addf %16, %25 : vector<32x256xf32>
    %c2_21 = arith.constant 2 : index
    %c2_22 = arith.constant 2 : index
    %27 = memref.load %arg1[%c2_21, %c2_22] : memref<3x4xf32, #tpu.memory_space<smem>>
    %c0_23 = arith.constant 0 : index
    %c0_24 = arith.constant 0 : index
    %28 = vector.load %arg11[%c0_23, %c0_24] : memref<32x32xf32, #tpu.memory_space<vmem>>, vector<32x32xf32>
    %29 = vector.broadcast %27 : f32 to vector<32x32xf32>
    %30 = arith.mulf %29, %28 : vector<32x32xf32>
    %31 = arith.addf %21, %30 : vector<32x32xf32>
    %c0_25 = arith.constant 0 : index
    %c0_26 = arith.constant 0 : index
    %c0_27 = arith.constant 0 : index
    %32 = vector.load %arg2[%c0_25, %c0_26, %c0_27] : memref<1x4x256xf32, #tpu.memory_space<vmem>>, vector<1x4x256xf32>
    %33 = vector.shape_cast %32 : vector<1x4x256xf32> to vector<4x256xf32>
    %cst = arith.constant dense<0.000000e+00> : vector<4x32xf32>
    %34 = tpu.matmul %33, %26, %cst {dimension_numbers = #tpu.dot_dimension_numbers<[1], [1], [0], [0], [0, 0, 1, 0], [], []>} : vector<4x256xf32>, vector<32x256xf32>, vector<4x32xf32> -> vector<4x32xf32>
    %c0_28 = arith.constant 0 : index
    %c0_29 = arith.constant 0 : index
    %35 = vector.load %arg7[%c0_28, %c0_29] : memref<1x32xf32, #tpu.memory_space<vmem>>, vector<1x32xf32>
    %36 = vector.broadcast %35 : vector<1x32xf32> to vector<4x32xf32>
    %37 = arith.addf %34, %36 : vector<4x32xf32>
    %cst_30 = arith.constant dense<0.000000e+00> : vector<32xf32>
    %38 = vector.multi_reduction <add>, %37, %cst_30 [0] : vector<4x32xf32> to vector<32xf32>
    %39 = vector.shape_cast %38 : vector<32xf32> to vector<1x32xf32>
    %cst_31 = arith.constant 2.500000e-01 : f32
    %40 = vector.broadcast %cst_31 : f32 to vector<1x32xf32>
    %41 = arith.mulf %39, %40 : vector<1x32xf32>
    %cst_32 = arith.constant dense<0.000000e+00> : vector<1x32xf32>
    %42 = tpu.matmul %41, %31, %cst_32 {dimension_numbers = #tpu.dot_dimension_numbers<[1], [1], [0], [0], [0, 0, 1, 0], [], []>} : vector<1x32xf32>, vector<32x32xf32>, vector<1x32xf32> -> vector<1x32xf32>
    %c0_33 = arith.constant 0 : index
    %c0_34 = arith.constant 0 : index
    %43 = vector.load %arg12[%c0_33, %c0_34] : memref<1x32xf32, #tpu.memory_space<vmem>>, vector<1x32xf32>
    %44 = arith.addf %42, %43 : vector<1x32xf32>
    %c0_35 = arith.constant 0 : index
    %c0_36 = arith.constant 0 : index
    %c0_37 = arith.constant 0 : index
    %45 = vector.load %arg13[%c0_35, %c0_36, %c0_37] : memref<1x1x32xf32, #tpu.memory_space<vmem>>, vector<1x1x32xf32>
    %46 = vector.shape_cast %45 : vector<1x1x32xf32> to vector<1x32xf32>
    %47 = vector.shape_cast %44 : vector<1x32xf32> to vector<1x1x32xf32>
    tpu.vector_store %arg13[%c0_35, %c0_36, %c0_37], %47 {strides = array<i32>} : memref<1x1x32xf32, #tpu.memory_space<vmem>>, vector<1x1x32xf32>,
    return
  }
  func.func @transform_0(%arg0: i32) -> (i32, i32) {
    %c0_i32 = arith.constant 0 : i32
    %c0_i32_0 = arith.constant 0 : i32
    %c0_i32_1 = arith.constant 0 : i32
    return %c0_i32, %c0_i32_0 : i32, i32
  }
  func.func @transform_1(%arg0: i32) -> (i32, i32, i32) {
    %c0_i32 = arith.constant 0 : i32
    %c0_i32_0 = arith.constant 0 : i32
    %c0_i32_1 = arith.constant 0 : i32
    return %arg0, %c0_i32, %c0_i32_0 : i32, i32, i32
  }
  func.func @transform_2(%arg0: i32) -> (i32, i32) {
    %c0_i32 = arith.constant 0 : i32
    %c0_i32_0 = arith.constant 0 : i32
    %c0_i32_1 = arith.constant 0 : i32
    return %c0_i32, %c0_i32_0 : i32, i32
  }
  func.func @transform_3(%arg0: i32) -> (i32, i32) {
    %c0_i32 = arith.constant 0 : i32
    %c0_i32_0 = arith.constant 0 : i32
    %c0_i32_1 = arith.constant 0 : i32
    return %c0_i32, %c0_i32_0 : i32, i32
  }
  func.func @transform_4(%arg0: i32) -> (i32, i32) {
    %c0_i32 = arith.constant 0 : i32
    %c0_i32_0 = arith.constant 0 : i32
    %c0_i32_1 = arith.constant 0 : i32
    return %c0_i32, %c0_i32_0 : i32, i32
  }
  func.func @transform_5(%arg0: i32) -> (i32, i32) {
    %c0_i32 = arith.constant 0 : i32
    %c0_i32_0 = arith.constant 0 : i32
    %c0_i32_1 = arith.constant 0 : i32
    return %c0_i32, %c0_i32_0 : i32, i32
  }
  func.func @transform_6(%arg0: i32) -> (i32, i32) {
    %c0_i32 = arith.constant 0 : i32
    %c0_i32_0 = arith.constant 0 : i32
    %c0_i32_1 = arith.constant 0 : i32
    return %c0_i32, %c0_i32_0 : i32, i32
  }
  func.func @transform_7(%arg0: i32) -> (i32, i32) {
    %c0_i32 = arith.constant 0 : i32
    %c0_i32_0 = arith.constant 0 : i32
    %c0_i32_1 = arith.constant 0 : i32
    return %c0_i32, %c0_i32_0 : i32, i32
  }
  func.func @transform_8(%arg0: i32) -> (i32, i32) {
    %c0_i32 = arith.constant 0 : i32
    %c0_i32_0 = arith.constant 0 : i32
    %c0_i32_1 = arith.constant 0 : i32
    return %c0_i32, %c0_i32_0 : i32, i32
  }
  func.func @transform_9(%arg0: i32) -> (i32, i32) {
    %c0_i32 = arith.constant 0 : i32
    %c0_i32_0 = arith.constant 0 : i32
    %c0_i32_1 = arith.constant 0 : i32
    return %c0_i32, %c0_i32_0 : i32, i32
  }
  func.func @transform_10(%arg0: i32) -> (i32, i32) {
    %c0_i32 = arith.constant 0 : i32
    %c0_i32_0 = arith.constant 0 : i32
    %c0_i32_1 = arith.constant 0 : i32
    return %c0_i32, %c0_i32_0 : i32, i32
  }
  func.func @transform_11(%arg0: i32) -> (i32, i32) {
    %c0_i32 = arith.constant 0 : i32
    %c0_i32_0 = arith.constant 0 : i32
    %c0_i32_1 = arith.constant 0 : i32
    return %c0_i32, %c0_i32_0 : i32, i32
  }
  func.func @transform_12(%arg0: i32) -> (i32, i32, i32) {
    %c0_i32 = arith.constant 0 : i32
    %c0_i32_0 = arith.constant 0 : i32
    %c0_i32_1 = arith.constant 0 : i32
    return %arg0, %c0_i32, %c0_i32_0 : i32, i32, i32
  }
}

</mosaic_0001>

<bundles_post_ra>
// kernel: weighted_image_encoder_forward.1
= control target key start
LH: loop header
LB: loop body
LE: loop exit
PB: predicated region body
PF: predicated region fallthrough
CT: control target
= control target key end

     0   :  { %s1347_s0 = inlined_call_operand.vmem [shape: f32[3,4], index: 0, kind: input, shape index: {}]   ;;  %s1348_s1 = inlined_call_operand.vmem [shape: f32[2,4,256], index: 1, kind: input, shape index: {}]   ;;  %s1349_s2 = inlined_call_operand.vmem [shape: f32[32,256], index: 2, kind: input, shape index: {}]   ;;  %s1350_s3 = inlined_call_operand.vmem [shape: f32[32,256], index: 3, kind: input, shape index: {}]   ;;  %s1351_s4 = inlined_call_operand.vmem [shape: f32[32,256], index: 4, kind: input, shape index: {}]   ;;  %s1352_s5 = inlined_call_operand.vmem [shape: f32[32,256], index: 5, kind: input, shape index: {}]   ;;  %s1353_s6 = inlined_call_operand.vmem [shape: f32[1,32], index: 6, kind: input, shape index: {}]   ;;  %s1354_s7 = inlined_call_operand.vmem [shape: f32[32,32], index: 7, kind: input, shape index: {}]   ;;  %s1355_s8 = inlined_call_operand.vmem [shape: f32[32,32], index: 8, kind: input, shape index: {}]   ;;  %s1356_s9 = inlined_call_operand.vmem [shape: f32[32,32], index: 9, kind: input, shape index: {}]   ;;  %s1357_s10 = inlined_call_operand.vmem [shape: f32[32,32], index: 10, kind: input, shape index: {}]   ;;  %s1358_s11 = inlined_call_operand.vmem [shape: f32[1,32], index: 11, kind: input, shape index: {}]   ;;  %s1359_s12 = inlined_call_operand.hbm [shape: f32[2,1,32], index: 12, kind: output, shape index: {}]  }
   0x1   :  { %1365 = sst [smem:[#allocation13_spill]] %s1347_s0 }
   0x2   :  { %17 = vsyncpa [#allocation4], 0 }
   0x3   :  { %18 = vsyncpa [#allocation3], 0 }
   0x4   :  { %20 = vsyncpa [#allocation3 + $0x1], 0  ;;  %s1058_s21 = smov 0   ;;  %s1060_s22 = smov 0  }
   0x5   :  { %s1062_s23 = smov 0   ;;  %s1064_s24 = smov 0  }
   0x6 LB: > { %1366 = sst [smem:[#allocation8_spill]] %s975_s21  ;;  %s1079_s25 = sadd.s32 4294967295, %s987_s24   ;;  %s987_s24 = sphi %s1064_s24, %s1377_s24   ;;  %s983_s23 = sphi %s1062_s23, %s1379_s23   ;;  %s979_s22 = sphi %s1060_s22, %s1381_s22   ;;  %s975_s21 = sphi %s1058_s21, %s1380_s21  }
   0x7   : > { %1367 = sst [smem:[#allocation9_spill]] %s983_s23  ;;  %s816_s26 = sadd.s32 4294967294, %s987_s24  }
   0x8   : > { %s1083_s27 = sadd.s32 1, %s987_s24   ;;  %s290_s28 = sadd.s32 1, %s983_s23 }
   0x9   : > { %1368 = sst [smem:[#allocation10_spill]] %s1083_s27  ;;  %s287_s29 = ssub.s32 %s987_s24, %s1083_s27 }
   0xa   : > { %p300_p0 = scmp.ne.s32.totalorder %s983_s23, %s979_s22  ;;  %p288_p1 = scmp.eq.s32.totalorder %s287_s29, 0 }
   0xb   : > { %p301_p2 = scmp.eq.s32.totalorder %s1079_s25, 1  ;;  %p306_p3 = scmp.ne.s32.totalorder %s979_s22, %s975_s21 }
   0xc   : > { %p307_p4 = scmp.eq.s32.totalorder %s816_s26, 1  ;;  %p817_p7 = scmp.ge.s32.totalorder %s987_s24, 1 }
   0xd   : > { %s1094_s30 = scalar_select %p288_p1, %s983_s23, %s290_s28  }
   0xe   : > { %p1096_p5 = por %p301_p2, %p300_p0  ;;  %p1100_p6 = por %p307_p4, %p306_p3 }
   0xf   : > { %1369 = sst [smem:[#allocation11_spill]] %s1094_s30  ;;  %p314_p8 = scmp.lt.s32.totalorder %s987_s24, 3 }
  0x10   : > { %s1371_s14 = scalar_select %p1100_p6, 1, 0 }
  0x11   : > { %p869_p9 = scmp.eq.s32.totalorder %s1079_s25, 0  ;;  %p1107_p10 = pnand %p817_p7, %p314_p8 }
  0x12   : > { %1372 = sst [smem:[#allocation12_spill]] %s1371_s14 }
  0x13   : > { %s1374_s0 = sld [smem:[#allocation13_spill]]  ;;  %p861_p11 = pneg %p1107_p10 }
  0x15   : > { %p862_p12 = pnand %p869_p9, %p861_p11 }
  0x17   : > { %p910_p0 = pneg %p862_p12 }
  0x19   : > { %s327_s18 = sshll.u32 %s1374_s0, 4  ;;  %s328_s18 = int_to_ptr.vmem [resolvable:$true] %s327_s18 }
  0x1a   : > { %s908_s19 = scalar_lea.vmem %s328_s18, 64  ;;  %p916_p3 = scmp.lt.s32.totalorder %s328_s18, %s328_s18 }
  0x1b   : > { %p909_p13 = scmp.ne.s32.totalorder %s328_s18, %s908_s19  ;;  %p917_p4 = scmp.lt.s32.totalorder %s908_s19, %s908_s19 }
  0x1d   : > { %p911_p1 = pnand %p910_p0, %p909_p13  ;;  %p918_p7 = por %p917_p4, %p916_p3 }
  0x1f   : > { %p912_p2 = pneg %p911_p1 }
  0x21   : > { %p919_p8 = pnand %p918_p7, %p912_p2 }
  0x23   : > { %922 = shalt.err (!%p919_p8)
}
  0x24   : > { %s989_s20 = smov [#allocation2]   ;;  %378 = sbr.rel (%p1107_p10) target bundleno = 493 (0x1ed), region = 68 }
  0x25   : > { %864 = dma.vmem_to_smem (!%p862_p12), %s328_s18, 64, %s989_s20, [#allocation4]  }
  0x29   : > { %966 = dma.done.wait (%p869_p9), [#allocation4], 64  }
  0x2a   : > { %968 = vsyncadd (%p869_p9), [#allocation4], 4294967232 }
  0x2b   : > { %384 = sfence }
  0x2c   : > { %s437_s26 = sld [smem:[#allocation2]]  ;;  %p420_p11 = scmp.lt.s32.totalorder %s1079_s25, 1  ;;  %v445_v0 = vld [vmem:[%s1350_s3 + $0x38] sm:$0xff]  ;;  %v444_v3 = vld [vmem:[%s1350_s3 + $0x30] sm:$0xff]  ;;  %v443_v4 = vld [vmem:[%s1350_s3 + $0x28] sm:$0xff]  ;;  %vm648_vm0 = vcmask 261120  }
  0x2d   : > { %s825_s28 = sld [smem:[#allocation2 + $0x80]]  ;;  %v432_v1 = vld [vmem:[%s1349_s2 + $0x38] sm:$0xff]  ;;  %v484_v6 = vld [vmem:[%s1351_s4 + $0x30] sm:$0xff]  ;;  %v483_v7 = vld [vmem:[%s1351_s4 + $0x28] sm:$0xff]  ;;  %vm991_vm1 = vmmov 0   ;;  %vm638_vm2 = vcmask 257024  }
  0x2e   : > { %s827_s29 = sld [smem:[#allocation2 + $0x100]]  ;;  %v485_v2 = vld [vmem:[%s1351_s4 + $0x38] sm:$0xff]  ;;  %v431_v9 = vld [vmem:[%s1349_s2 + $0x30] sm:$0xff]  ;;  %v430_v11 = vld [vmem:[%s1349_s2 + $0x28] sm:$0xff]  ;;  %s835_s21 = sshll.u32 %s1079_s25, 4  ;;  %vm734_vm3 = vcmask 253952  }
  0x2f   : > { %v525_v5 = vld [vmem:[%s1352_s5 + $0x38] sm:$0xff]  ;;  %s1150_s19 = scalar_select %p420_p11, %s1079_s25, 1  ;;  %v524_v10 = vld [vmem:[%s1352_s5 + $0x30] sm:$0xff]  ;;  %v523_v16 = vld [vmem:[%s1352_s5 + $0x28] sm:$0xff] }
  0x30   : > { %v442_v17 = vld [vmem:[%s1350_s3 + $0x20] sm:$0xff]  ;;  %v441_v24 = vld [vmem:[%s1350_s3 + $0x18] sm:$0xff]  ;;  %v440_v37 = vld [vmem:[%s1350_s3 + $0x10] sm:$0xff]  ;;  %s826_s18 = sld [smem:[#allocation2 + $0x82]]  ;;  %s992_s25 = smov [#allocation5]  }
  0x31   : > { %v482_v18 = vld [vmem:[%s1351_s4 + $0x20] sm:$0xff]  ;;  %v481_v30 = vld [vmem:[%s1351_s4 + $0x18] sm:$0xff]  ;;  %s838_s16 = sshll.u32 %s1150_s19, 3  ;;  %v480_v42 = vld [vmem:[%s1351_s4 + $0x10] sm:$0xff]  ;;  %s828_s15 = sld [smem:[#allocation2 + $0x102]] }
  0x32   : > { %v1152_v8 = vstv %s437_s26  ;;  %v522_v23 = vld [vmem:[%s1352_s5 + $0x20] sm:$0xff]  ;;  %v521_v31 = vld [vmem:[%s1352_s5 + $0x18] sm:$0xff]  ;;  %v427_v47 = vld [vmem:[%s1349_s2 + $0x10] sm:$0xff]  ;;  %s424_s17 = scalar_lea.vmem %s1348_s1, %s838_s16  ;;  %s418_s16 = sand.u32 1, %s979_s22  }
  0x33   : > { %v454_v12 = vmul.f32 %v1152_v8, %v445_v0  ;;  %v486_v13 = vstv %s825_s28  ;;  %v453_v14 = vmul.f32 %v1152_v8, %v444_v3  ;;  %v452_v15 = vmul.f32 %v1152_v8, %v443_v4  ;;  %v429_v29 = vld [vmem:[%s1349_s2 + $0x20] sm:$0xff]  ;;  %v428_v36 = vld [vmem:[%s1349_s2 + $0x18] sm:$0xff]  ;;  %v439_v48 = vld [vmem:[%s1350_s3 + $0x8] sm:$0xff]  ;;  %s927_s28 = sshll.u32 %s992_s25, 4  ;;  %s928_s28 = int_to_ptr.vmem [resolvable:$false] %s927_s28 }
  0x34   : > { %v494_v19 = vmul.f32 %v486_v13, %v485_v2  ;;  %v1175_v20 = vstv %s827_s29  ;;  %v493_v21 = vmul.f32 %v486_v13, %v484_v6  ;;  %v492_v22 = vmul.f32 %v486_v13, %v483_v7  ;;  %v479_v49 = vld [vmem:[%s1351_s4 + $0x8] sm:$0xff]  ;;  %v520_v54 = vld [vmem:[%s1352_s5 + $0x10] sm:$0xff]  ;;  %v438_v55 = vld [vmem:[%s1350_s3] sm:$0xff]  ;;  %s419_s29 = scalar_lea.vmem [#allocation5], %s418_s16  ;;  %s929_s19 = scalar_lea.vmem %s928_s28, 32 }
  0x35   : > { %v462_v25 = vadd.f32 %v454_v12, %v432_v1  ;;  %v534_v26 = vmul.f32 %v1175_v20, %v525_v5  ;;  %v461_v27 = vadd.f32 %v453_v14, %v431_v9  ;;  %v533_v28 = vmul.f32 %v1175_v20, %v524_v10  ;;  %v478_v56 = vld [vmem:[%s1351_s4] sm:$0xff]  ;;  %v426_v60 = vld [vmem:[%s1349_s2 + $0x8] sm:$0xff]  ;;  %s749_s14 = sshll.u32 %s419_s29, 4  ;;  %s750_s14 = int_to_ptr.vmem [resolvable:$true] %s749_s14 }
  0x36   : > { %v460_v32 = vadd.f32 %v452_v15, %v430_v11  ;;  %v532_v33 = vmul.f32 %v1175_v20, %v523_v16  ;;  %v451_v34 = vmul.f32 %v1152_v8, %v442_v17  ;;  %v491_v35 = vmul.f32 %v486_v13, %v482_v18  ;;  %v519_v61 = vld [vmem:[%s1352_s5 + $0x8] sm:$0xff]  ;;  %v425_v2 = vld [vmem:[%s1349_s2] sm:$0xff]  ;;  %p930_p13 = scmp.lt.s32.totalorder %s750_s14, %s928_s28 }
  0x37   : > { %v502_v38 = vadd.f32 %v494_v19, %v462_v25  ;;  %v501_v39 = vadd.f32 %v493_v21, %v461_v27  ;;  %v531_v40 = vmul.f32 %v1175_v20, %v522_v23  ;;  %v450_v41 = vmul.f32 %v1152_v8, %v441_v24  ;;  %v557_v3 = vld [vmem:[%s424_s17] sm:$0xff]  ;;  %s824_s17 = sld [smem:[#allocation2 + $0x2]]  ;;  %v507_v25 = vld [vmem:[%s1356_s9 + $0x18] sm:$0xff] }
  0x38   : > { %v500_v43 = vadd.f32 %v492_v22, %v460_v32  ;;  %v459_v44 = vadd.f32 %v451_v34, %v429_v29  ;;  %v490_v45 = vmul.f32 %v486_v13, %v481_v30  ;;  %v530_v46 = vmul.f32 %v1175_v20, %v521_v31  ;;  %v518_v14 = vld [vmem:[%s1352_s5] sm:$0xff]  ;;  %v467_v22 = vld [vmem:[%s1355_s8 + $0x18] sm:$0xff]  ;;  %v466_v31 = vld [vmem:[%s1355_s8 + $0x10] sm:$0xff] }
  0x39   : > { %v542_v50 = vadd.f32 %v534_v26, %v502_v38  ;;  %v541_v51 = vadd.f32 %v533_v28, %v501_v39  ;;  %v458_v52 = vadd.f32 %v450_v41, %v428_v36  ;;  %v449_v53 = vmul.f32 %v1152_v8, %v440_v37  ;;  %v547_v29 = vld [vmem:[%s1357_s10 + $0x18] sm:$0xff]  ;;  %v506_v36 = vld [vmem:[%s1356_s9 + $0x10] sm:$0xff] }
  0x3a   : > { %v540_v57 = vadd.f32 %v532_v33, %v500_v43  ;;  %v499_v58 = vadd.f32 %v491_v35, %v459_v44  ;;  %v489_v59 = vmul.f32 %v486_v13, %v480_v42  ;;  %v448_v0 = vmul.f32 %v1152_v8, %v439_v48  ;;  %v435_v35 = vld [vmem:[%s1354_s7 + $0x10] sm:$0xff]  ;;  %v465_v42 = vld [vmem:[%s1355_s8 + $0x8] sm:$0xff] }
  0x3b   : > { %592 = vmatprep.subr.mxu0 %v542_v50  ;;  %v498_v62 = vadd.f32 %v490_v45, %v458_v52  ;;  %v457_v63 = vadd.f32 %v449_v53, %v427_v47  ;;  %v488_v1 = vmul.f32 %v486_v13, %v479_v49  ;;  %v529_v5 = vmul.f32 %v1175_v20, %v520_v54  ;;  %v546_v41 = vld [vmem:[%s1357_s10 + $0x10] sm:$0xff]  ;;  %v505_v47 = vld [vmem:[%s1356_s9 + $0x8] sm:$0xff]  ;;  %v464_v52 = vld [vmem:[%s1355_s8] sm:$0xff] }
  0x3c   : > { %593 = vmatpush1.xpose.msra.mxu0 %v541_v51  ;;  %v539_v4 = vadd.f32 %v531_v40, %v499_v58  ;;  %v447_v6 = vmul.f32 %v1152_v8, %v438_v55  ;;  %v487_v7 = vmul.f32 %v486_v13, %v478_v56  ;;  %v456_v11 = vadd.f32 %v448_v0, %v426_v60  ;;  %v545_v51 = vld [vmem:[%s1357_s10 + $0x8] sm:$0xff]  ;;  %v433_v56 = vld [vmem:[%s1354_s7] sm:$0xff] }
  0x3d   : > { %594 = vmatprep.subr.mxu0 %v540_v57  ;;  %v538_v9 = vadd.f32 %v530_v46, %v498_v62  ;;  %v497_v10 = vadd.f32 %v489_v59, %v457_v63  ;;  %v528_v12 = vmul.f32 %v1175_v20, %v519_v61  ;;  %v566_v16 = vcombine.high %v557_v3, %v557_v3  ;;  %v434_v46 = vld [vmem:[%s1354_s7 + $0x8] sm:$0xff]  ;;  %v504_v57 = vld [vmem:[%s1356_s9] sm:$0xff] }
  0x3e   : > { %v455_v15 = vadd.f32 %v447_v6, %v425_v2  ;;  %v496_v17 = vadd.f32 %v488_v1, %v456_v11  ;;  %v527_v21 = vmul.f32 %v1175_v20, %v518_v14  ;;  %v468_v23 = vstv %s824_s17  ;;  %v436_v20 = vld [vmem:[%s1354_s7 + $0x18] sm:$0xff]  ;;  %v544_v61 = vld [vmem:[%s1357_s10] sm:$0xff]  ;;  %s1312_s17 = scalar_lea.hbm %s1359_s12, %s835_s21 }
  0x3f   : > { %v537_v18 = vadd.f32 %v529_v5, %v497_v10  ;;  %632 = vmatprep.mubr.f32.mxu0 %v566_v16  ;;  %v472_v24 = vmul.f32 %v468_v23, %v467_v22  ;;  %v508_v26 = vstv %s826_s18  ;;  %v548_v30 = vstv %s828_s15  ;;  %v829_v1 = vld [vmem:[%s1353_s6] ss:$0 sm:$0xff]  ;;  %s737_s18 = scalar_lea.sflag [#allocation3], %s418_s16  ;;  %s923_s15 = scalar_lea.vmem %s750_s14, 16 }
  0x40   : > { %595 = vmatpush1.xpose.msra.mxu0 %v539_v4  ;;  %v495_v19 = vadd.f32 %v487_v7, %v455_v15  ;;  %v536_v8 = vadd.f32 %v528_v12, %v496_v17  ;;  %v512_v28 = vmul.f32 %v508_v26, %v507_v25  ;;  %v552_v33 = vmul.f32 %v548_v30, %v547_v29  ;;  %v647_v15 = vld [vmem:[%s1358_s11] sm:$0x1]  ;;  %p924_p9 = scmp.ne.s32.totalorder %s750_s14, %s923_s15  ;;  %p931_p0 = scmp.lt.s32.totalorder %s929_s19, %s923_s15 }
  0x41   : > { %596 = vmatprep.subr.mxu0 %v538_v9  ;;  %v476_v27 = vadd.f32 %v472_v24, %v436_v20  ;;  %v471_v34 = vmul.f32 %v468_v23, %v466_v31  ;;  %v990_v39 = vmov 0.0   ;;  %v511_v40 = vmul.f32 %v508_v26, %v506_v36 }
  0x42   : > { %v535_v13 = vadd.f32 %v527_v21, %v495_v19  ;;  %844 = vmatprep.subr.mxu1 %v990_v39  ;;  %v551_v43 = vmul.f32 %v548_v30, %v546_v41  ;;  %v470_v44 = vmul.f32 %v468_v23, %v465_v42  ;;  %v510_v49 = vmul.f32 %v508_v26, %v505_v47  ;;  %p925_p10 = pnand %p924_p9, %p1096_p5  ;;  %p932_p1 = por %p931_p0, %p930_p13 }
  0x43   : > { %v516_v32 = vadd.f32 %v512_v28, %v476_v27  ;;  %v475_v38 = vadd.f32 %v471_v34, %v435_v35  ;;  %v550_v54 = vmul.f32 %v548_v30, %v545_v51  ;;  %v469_v55 = vmul.f32 %v468_v23, %v464_v52  ;;  %852 = vmatprep.mubr.msk.f32.mxu1 %vm991_vm1, %v990_v39 }
  0x44   : > { %597 = vmatpush1.xpose.msra.mxu0 %v537_v18  ;;  %v474_v48 = vadd.f32 %v470_v44, %v434_v46  ;;  %v509_v60 = vmul.f32 %v508_v26, %v504_v57  ;;  %v549_v63 = vmul.f32 %v548_v30, %v544_v61  ;;  %p926_p12 = pneg %p925_p10 }
  0x45   : > { %598 = vmatprep.subr.mxu0 %v536_v8  ;;  %v556_v37 = vadd.f32 %v552_v33, %v516_v32  ;;  %v515_v45 = vadd.f32 %v511_v40, %v475_v38  ;;  %v473_v59 = vadd.f32 %v469_v55, %v433_v56 }
  0x46   : > { %v514_v53 = vadd.f32 %v510_v49, %v474_v48  ;;  %p933_p2 = pnand %p932_p1, %p926_p12 }
  0x47   : > { %845 = vmatpush3.xpose.msk.msra.mxu1 %vm648_vm0, %v556_v37  ;;  %v555_v50 = vadd.f32 %v551_v43, %v515_v45  ;;  %v513_v62 = vadd.f32 %v509_v60, %v473_v59 }
  0x48   : > { %599 = vmatpush1.xpose.msra.mxu0 %v535_v13  ;;  %846 = vmatprep.subr.mxu1 %v990_v39  ;;  %v554_v58 = vadd.f32 %v550_v54, %v514_v53 }
  0x49   : > { %v553_v0 = vadd.f32 %v549_v63, %v513_v62 }
  0x4b   : > { %633 = vmatmul.mubr.f32.vlgmr.msra.gmra.mxu0 %v557_v3  ;;  %847 = vmatpush3.xpose.msk.msra.mxu1 %vm648_vm0, %v555_v50 }
  0x4c   : > { %848 = vmatprep.subr.mxu1 %v990_v39 }
  0x4f   : > { %849 = vmatpush3.xpose.msk.msra.mxu1 %vm648_vm0, %v554_v58 }
  0x50   : > { %850 = vmatprep.subr.mxu1 %v990_v39 }
  0x53   : > { %851 = vmatpush3.xpose.msk.msra.mxu1 %vm648_vm0, %v553_v0 }
 0x10b   : > { %v634_v2 = vpop.f32.mrf.mxu0 }
 0x10c   : > { %v635_v3 = vadd.f32 %v829_v1, %v634_v2 }
 0x10d   : > { %v636_v4 = vpop.f32.mrf.mxu0 }
 0x10e   : > { %v639_v5 = vsel %vm638_vm2, %v635_v3, 0.0 }
 0x10f   : > { %v640_v6 = vrot.slane %v639_v5, 4 }
 0x111   : > { %v641_v7 = vadd.f32 %v640_v6, %v639_v5 }
 0x113   : > { %v642_v9 = vrot.slane %v641_v7, 2 }
 0x115   : > { %v643_v10 = vadd.f32 %v642_v9, %v641_v7 }
 0x117   : > { %v644_v11 = vrot.slane %v643_v10, 1 }
 0x119   : > { %v645_v12 = vadd.f32 %v644_v11, %v643_v10 }
 0x11b   : > { %v646_v14 = vmul.f32 0.25, %v645_v12 }
 0x11d   : > { %853 = vmatmul.mubr.msk.f32.vlgmr.msra.gmra.mxu1 %vm648_vm0, %v646_v14 }
 0x1dd   : > { %v730_v16 = vpop.f32.mrf.mxu1 }
 0x1de   : > { %v731_v17 = vadd.f32 %v730_v16, %v647_v15 }
 0x1df   : > { %v854_v18 = vpop.f32.mrf.mxu1 }
 0x1e0   : > { %735 = vst.msk [vmem:[%s419_s29] sm:$0x1] %vm734_vm3, %v731_v17 }
 0x1e1   : > { %936 = shalt.err (!%p933_p2)
}
 0x1e2   : > { %s937_s0 = scalar_lea.hbm %s1312_s17, 16  ;;  %s941_s23 = scalar_lea.hbm %s1359_s12, 32 }
 0x1e3   : > { %p938_p3 = scmp.ne.s32.totalorder %s1312_s17, %s937_s0  ;;  %p942_p8 = scmp.lt.s32.totalorder %s1312_s17, %s1359_s12 }
 0x1e4   : > { %p943_p11 = scmp.lt.s32.totalorder %s941_s23, %s937_s0 }
 0x1e5   : > { %p939_p4 = pnand %p938_p3, %p1096_p5 }
 0x1e6   : > { %p944_p9 = por %p943_p11, %p942_p8 }
 0x1e7   : > { %p940_p7 = pneg %p939_p4 }
 0x1e9   : > { %p945_p10 = pnand %p944_p9, %p940_p7 }
 0x1eb   : > { %948 = shalt.err (!%p945_p10)
}
 0x1ec   : > { %859 = dma.vmem_to_hbm [thread:$0]  (%p1096_p5), %s750_s14, 16, %s1312_s17, %s737_s18  }
 0x1ed PF: > { %s1375_s29 = sld [smem:[#allocation8_spill]]  ;;  %p871_p12 = scmp.ge.s32.totalorder %s987_s24, 2 }
 0x1ef   : > { %p866_p13 = pnand %p871_p12, %p1100_p6 }
 0x1f1   : > { %p867_p0 = pneg %p866_p13 }
 0x1f3   : > { %s761_s20 = sand.u32 1, %s1375_s29  }
 0x1f4   : > { %s762_s15 = scalar_lea.sflag [#allocation3], %s761_s20 }
 0x1f5   : > { %970 = dma.done.wait (%p867_p0), %s762_s15, 16  }
 0x1f6   : > { %972 = vsyncadd (%p867_p0), %s762_s15, 4294967280  ;;  %s1377_s24 = sld [smem:[#allocation10_spill]]  ;;  %s1380_s21 = smov %s979_s22 }
 0x1f7   : > { %s1378_s25 = sld [smem:[#allocation9_spill]] }
 0x1f8   : > { %s1379_s23 = sld [smem:[#allocation11_spill]] }
 0x1fc   : > { %p23_p1 = scmp.ge.s32.totalorder %s1377_s24, 4  }
 0x1fd   : > { %s1381_s22 = smov %s1378_s25 }
 0x1fe   :  { %25 = sbr.rel (!%p23_p1) target bundleno = 6 (0x6), region = 108 }
 0x203   :  { %766 = vsyncpa [#allocation3], 1 }
 0x204   :  { %768 = vsyncpa [#allocation3 + $0x1], 1 }
 0x205   :  { %769 = vsyncpa [#allocation4], 1 }
 0x206   :  { %771 = vsyncpa [#allocation4 + $0x1], 1 }

</bundles_post_ra>
